<compile_context>
chip_gen: v7x
topology: tpu7x:2x2x1
jax: 0.10.0
libtpu: 0.0.40
codegen_flags: <defaults>
</compile_context>

<pallas_src>
import functools

import jax
import jax.numpy as jnp
from jax.experimental import pallas as pl
from jax.experimental.pallas import tpu as pltpu

# ----------------------- model hyper-parameters ------------------------------
BATCH = 8
IN_FEATURES = 392          # 2 * 14 * 14  (MNIST-pair input, no weight sharing)
HIDDEN = 64                # args.hidden_unit
H_PAD = 128                # lane-dense padded hidden width (zeros beyond HIDDEN)
BLOCK_NUM = 2              # args.block_num
OUT_FEATURES = 2
OUT_PAD = 128              # fc2 weight padded to 128 output lanes (MXU-friendly);
                           # only the first OUT_FEATURES columns are stored.

# TODO(synk): dropout (args.use_dropout=True) not implemented — eval-mode dropout
# is identity; training-mode dropout would need pltpu.prng_* in-kernel.


def _round_up(x, m):
    return ((x + m - 1) // m) * m


# ------------------------------ Pallas kernel --------------------------------
def mlp_kernel(x_ref, w1_ref, b1_ref, wb_ref, bb_ref, w2_ref, b2_ref, o_ref,
               *, block_num):
    # fc1 + ReLU: bf16 operands on the MXU, f32 accumulation / epilogue.
    y = jnp.dot(x_ref[...], w1_ref[...], preferred_element_type=jnp.float32)
    y = jnp.maximum(y + b1_ref[...], 0.0)

    # perceptron blocks: Linear(H,H) + ReLU, static unrolled loop.
    # Activations stay f32 for bias+ReLU (v5e VPU has no bf16 VALU);
    # cast to bf16 only at the MXU input.
    for blk in range(block_num):
        y = jnp.dot(y.astype(wb_ref.dtype), wb_ref[blk],
                    preferred_element_type=jnp.float32)
        y = jnp.maximum(y + bb_ref[blk], 0.0)

    # fc2: MXU sees a lane-dense (H_PAD, OUT_PAD) weight; only the first
    # OUT_FEATURES columns carry real logits, and only those are written back
    # (narrow output ref -> no padded HBM writeback).
    out = jnp.dot(y.astype(w2_ref.dtype), w2_ref[...],
                  preferred_element_type=jnp.float32)
    out = out + b2_ref[...]
    o_ref[...] = out[:, :OUT_FEATURES].astype(o_ref.dtype)


# ------------------------- one-time parameter prep ---------------------------
def prepare_params(params):
    """Cast weights to bf16 and zero-pad the hidden dim to H_PAD. Do this ONCE;
    the forward path only consumes the prepared tensors."""
    w1, b1, wb, bb, w2, b2 = params
    w1p = jnp.zeros((IN_FEATURES, H_PAD), jnp.bfloat16)
    w1p = w1p.at[:, :HIDDEN].set(w1.astype(jnp.bfloat16))
    b1p = jnp.zeros((1, H_PAD), jnp.float32).at[:, :HIDDEN].set(b1)

    wbp = jnp.zeros((BLOCK_NUM, H_PAD, H_PAD), jnp.bfloat16)
    wbp = wbp.at[:, :HIDDEN, :HIDDEN].set(wb.astype(jnp.bfloat16))
    bbp = jnp.zeros((BLOCK_NUM, 1, H_PAD), jnp.float32).at[:, :, :HIDDEN].set(bb)

    w2p = jnp.zeros((H_PAD, OUT_PAD), jnp.bfloat16)
    w2p = w2p.at[:HIDDEN, :OUT_FEATURES].set(w2.astype(jnp.bfloat16))
    b2p = jnp.zeros((1, OUT_PAD), jnp.float32).at[:, :OUT_FEATURES].set(b2)
    return w1p, b1p, wbp, bbp, w2p, b2p


# --------------------------------- forward ------------------------------------
def mlp_forward(x_nchw, prepared_params, *, tile_b=512):
    """x_nchw: (B, 2, 14, 14) float32. prepared_params: output of prepare_params.
    Returns (B, 2) float32 logits."""
    w1, b1, wb, bb, w2, b2 = prepared_params
    b = x_nchw.shape[0]
    x_flat = x_nchw.reshape(b, -1).astype(jnp.bfloat16)   # == torch x.view(B, -1)

    # Batch tiling:
    #   large  : tile_b-row tiles, pipelined + megacore-parallel (HBM-bound)
    #   medium : split into exactly 2 grid steps so v7x's 2 TCs both work
    #   small  : single block, rounded to 16 rows (bf16 sublane packing)
    if b >= 2 * tile_b:
        b_pad = _round_up(b, tile_b)
    elif b >= 64:
        tile_b = _round_up((b + 1) // 2, 16)
        b_pad = 2 * tile_b
    else:
        tile_b = _round_up(max(b, 16), 16)
        b_pad = tile_b
    if b_pad != b:
        x_flat = jnp.pad(x_flat, ((0, b_pad - b), (0, 0)))

    kernel = functools.partial(mlp_kernel, block_num=BLOCK_NUM)

    in_specs = [
        pl.BlockSpec((tile_b, IN_FEATURES), lambda i: (i, 0)),  # x: tiled on batch
        pl.BlockSpec(w1.shape, lambda i: (0, 0)),               # weights/biases stay
        pl.BlockSpec(b1.shape, lambda i: (0, 0)),               # VMEM-resident across
        pl.BlockSpec(wb.shape, lambda i: (0, 0, 0)),            # all grid steps
        pl.BlockSpec(bb.shape, lambda i: (0, 0, 0)),
        pl.BlockSpec(w2.shape, lambda i: (0, 0)),
        pl.BlockSpec(b2.shape, lambda i: (0, 0)),
    ]
    # Narrow output: only the 2 real logit columns ever hit HBM.
    out_spec = pl.BlockSpec((tile_b, OUT_FEATURES), lambda i: (i, 0))

    out = pl.pallas_call(
        kernel,
        out_shape=jax.ShapeDtypeStruct((b_pad, OUT_FEATURES), jnp.float32),
        grid=(b_pad // tile_b,),
        in_specs=in_specs,
        out_specs=out_spec,
        compiler_params=pltpu.CompilerParams(
            dimension_semantics=("parallel",)),   # shard batch tiles across TCs
    )(x_flat, w1, b1, wb, bb, w2, b2)

    return out[:b]


# -------------------------- deterministic params ------------------------------
def init_linear(key, fan_in, fan_out):
    """PyTorch nn.Linear default init: U(-1/sqrt(fan_in), 1/sqrt(fan_in))."""
    kw, kb = jax.random.split(key)
    bound = 1.0 / jnp.sqrt(jnp.float32(fan_in))
    w = jax.random.uniform(kw, (fan_in, fan_out), jnp.float32, -bound, bound)
    bias = jax.random.uniform(kb, (1, fan_out), jnp.float32, -bound, bound)
    return w, bias


def init_params(key):
    keys = jax.random.split(key, 2 + BLOCK_NUM)
    w1, b1 = init_linear(keys[0], IN_FEATURES, HIDDEN)
    wbs, bbs = [], []
    for i in range(BLOCK_NUM):
        w, bias = init_linear(keys[1 + i], HIDDEN, HIDDEN)
        wbs.append(w)
        bbs.append(bias)
    wb = jnp.stack(wbs, axis=0)          # (block_num, H, H)
    bb = jnp.stack(bbs, axis=0)          # (block_num, 1, H)
    w2, b2 = init_linear(keys[-1], HIDDEN, OUT_FEATURES)
    return w1, b1, wb, bb, w2, b2


# -------------------------------- reference -----------------------------------
def mlp_reference(x_nchw, params):
    """Full-precision (f32) reference matching the PyTorch forward."""
    w1, b1, wb, bb, w2, b2 = params
    y = x_nchw.reshape(x_nchw.shape[0], -1)
    y = jnp.maximum(y @ w1 + b1, 0.0)
    for blk in range(BLOCK_NUM):
        y = jnp.maximum(y @ wb[blk] + bb[blk], 0.0)
    return y @ w2 + b2


if __name__ == "__main__":
    key = jax.random.PRNGKey(0)
    kx, kp = jax.random.split(key)
    x = jax.random.normal(kx, (BATCH, 2, 14, 14), jnp.float32)
    params = init_params(kp)

    prepared = jax.block_until_ready(prepare_params(params))   # one-time prep

    out = mlp_forward(x, prepared)
    out = jax.block_until_ready(out)

    ref = mlp_reference(x, params)
    assert out.shape == (BATCH, OUT_FEATURES), out.shape
    # bf16 weights/input with f32 accumulation: allow ~1e-2-level deviation.
    assert jnp.allclose(out, ref, atol=3e-2, rtol=3e-2), (out, ref)

    print("KERNEL_OK")
</pallas_src>

<mosaic_0001>
module attributes {stable_mosaic.version = 11 : i64} {
  func.func @mlp_kernel(%arg0: i32, %arg1: memref<16x392xbf16, #tpu.memory_space<vmem>>, %arg2: memref<392x128xbf16, #tpu.memory_space<vmem>>, %arg3: memref<1x128xf32, #tpu.memory_space<vmem>>, %arg4: memref<2x128x128xbf16, #tpu.memory_space<vmem>>, %arg5: memref<2x1x128xf32, #tpu.memory_space<vmem>>, %arg6: memref<128x128xbf16, #tpu.memory_space<vmem>>, %arg7: memref<1x128xf32, #tpu.memory_space<vmem>>, %arg8: memref<16x2xf32, #tpu.memory_space<vmem>>) attributes {dimension_semantics = [#tpu.dimension_semantics<parallel>], iteration_bounds = array<i64: 1>, scalar_prefetch = 0 : i64, scratch_operands = 0 : i64, tpu.core_type = #tpu.core_type<tc>, window_params = [{transform_indices = @transform_0, window_bounds = array<i64: 16, 392>}, {pipeline_mode = #tpu.pipeline_mode<synchronous>, transform_indices = @transform_1, window_bounds = array<i64: 392, 128>}, {pipeline_mode = #tpu.pipeline_mode<synchronous>, transform_indices = @transform_2, window_bounds = array<i64: 1, 128>}, {pipeline_mode = #tpu.pipeline_mode<synchronous>, transform_indices = @transform_3, window_bounds = array<i64: 2, 128, 128>}, {pipeline_mode = #tpu.pipeline_mode<synchronous>, transform_indices = @transform_4, window_bounds = array<i64: 2, 1, 128>}, {pipeline_mode = #tpu.pipeline_mode<synchronous>, transform_indices = @transform_5, window_bounds = array<i64: 128, 128>}, {pipeline_mode = #tpu.pipeline_mode<synchronous>, transform_indices = @transform_6, window_bounds = array<i64: 1, 128>}, {transform_indices = @transform_7, window_bounds = array<i64: 16, 2>}]} {
    %c0 = arith.constant 0 : index
    %c0_0 = arith.constant 0 : index
    %0 = vector.load %arg1[%c0, %c0_0] : memref<16x392xbf16, #tpu.memory_space<vmem>>, vector<16x392xbf16>
    %c0_1 = arith.constant 0 : index
    %c0_2 = arith.constant 0 : index
    %1 = vector.load %arg2[%c0_1, %c0_2] : memref<392x128xbf16, #tpu.memory_space<vmem>>, vector<392x128xbf16>
    %cst = arith.constant dense<0.000000e+00> : vector<16x128xf32>
    %2 = tpu.matmul %0, %1, %cst {dimension_numbers = #tpu.dot_dimension_numbers<[1], [0], [0], [1], [0, 0, 1, 1], [], []>} : vector<16x392xbf16>, vector<392x128xbf16>, vector<16x128xf32> -> vector<16x128xf32>
    %c0_3 = arith.constant 0 : index
    %c0_4 = arith.constant 0 : index
    %3 = vector.load %arg3[%c0_3, %c0_4] : memref<1x128xf32, #tpu.memory_space<vmem>>, vector<1x128xf32>
    %4 = vector.broadcast %3 : vector<1x128xf32> to vector<16x128xf32>
    %5 = arith.addf %2, %4 : vector<16x128xf32>
    %cst_5 = arith.constant 0.000000e+00 : f32
    %6 = vector.broadcast %cst_5 : f32 to vector<16x128xf32>
    %7 = arith.maximumf %5, %6 : vector<16x128xf32>
    %8 = arith.truncf %7 : vector<16x128xf32> to vector<16x128xbf16>
    %c0_6 = arith.constant 0 : index
    %c0_7 = arith.constant 0 : index
    %c0_8 = arith.constant 0 : index
    %9 = vector.load %arg4[%c0_6, %c0_7, %c0_8] : memref<2x128x128xbf16, #tpu.memory_space<vmem>>, vector<1x128x128xbf16>
    %10 = vector.shape_cast %9 : vector<1x128x128xbf16> to vector<128x128xbf16>
    %cst_9 = arith.constant dense<0.000000e+00> : vector<16x128xf32>
    %11 = tpu.matmul %8, %10, %cst_9 {dimension_numbers = #tpu.dot_dimension_numbers<[1], [0], [0], [1], [0, 0, 1, 1], [], []>} : vector<16x128xbf16>, vector<128x128xbf16>, vector<16x128xf32> -> vector<16x128xf32>
    %c0_10 = arith.constant 0 : index
    %c0_11 = arith.constant 0 : index
    %c0_12 = arith.constant 0 : index
    %12 = vector.load %arg5[%c0_10, %c0_11, %c0_12] : memref<2x1x128xf32, #tpu.memory_space<vmem>>, vector<1x1x128xf32>
    %13 = vector.shape_cast %12 : vector<1x1x128xf32> to vector<1x128xf32>
    %14 = vector.broadcast %13 : vector<1x128xf32> to vector<16x128xf32>
    %15 = arith.addf %11, %14 : vector<16x128xf32>
    %cst_13 = arith.constant 0.000000e+00 : f32
    %16 = vector.broadcast %cst_13 : f32 to vector<16x128xf32>
    %17 = arith.maximumf %15, %16 : vector<16x128xf32>
    %18 = arith.truncf %17 : vector<16x128xf32> to vector<16x128xbf16>
    %c1 = arith.constant 1 : index
    %c0_14 = arith.constant 0 : index
    %c0_15 = arith.constant 0 : index
    %19 = vector.load %arg4[%c1, %c0_14, %c0_15] : memref<2x128x128xbf16, #tpu.memory_space<vmem>>, vector<1x128x128xbf16>
    %20 = vector.shape_cast %19 : vector<1x128x128xbf16> to vector<128x128xbf16>
    %cst_16 = arith.constant dense<0.000000e+00> : vector<16x128xf32>
    %21 = tpu.matmul %18, %20, %cst_16 {dimension_numbers = #tpu.dot_dimension_numbers<[1], [0], [0], [1], [0, 0, 1, 1], [], []>} : vector<16x128xbf16>, vector<128x128xbf16>, vector<16x128xf32> -> vector<16x128xf32>
    %c1_17 = arith.constant 1 : index
    %c0_18 = arith.constant 0 : index
    %c0_19 = arith.constant 0 : index
    %22 = vector.load %arg5[%c1_17, %c0_18, %c0_19] : memref<2x1x128xf32, #tpu.memory_space<vmem>>, vector<1x1x128xf32>
    %23 = vector.shape_cast %22 : vector<1x1x128xf32> to vector<1x128xf32>
    %24 = vector.broadcast %23 : vector<1x128xf32> to vector<16x128xf32>
    %25 = arith.addf %21, %24 : vector<16x128xf32>
    %cst_20 = arith.constant 0.000000e+00 : f32
    %26 = vector.broadcast %cst_20 : f32 to vector<16x128xf32>
    %27 = arith.maximumf %25, %26 : vector<16x128xf32>
    %28 = arith.truncf %27 : vector<16x128xf32> to vector<16x128xbf16>
    %c0_21 = arith.constant 0 : index
    %c0_22 = arith.constant 0 : index
    %29 = vector.load %arg6[%c0_21, %c0_22] : memref<128x128xbf16, #tpu.memory_space<vmem>>, vector<128x128xbf16>
    %cst_23 = arith.constant dense<0.000000e+00> : vector<16x128xf32>
    %30 = tpu.matmul %28, %29, %cst_23 {dimension_numbers = #tpu.dot_dimension_numbers<[1], [0], [0], [1], [0, 0, 1, 1], [], []>} : vector<16x128xbf16>, vector<128x128xbf16>, vector<16x128xf32> -> vector<16x128xf32>
    %c0_24 = arith.constant 0 : index
    %c0_25 = arith.constant 0 : index
    %31 = vector.load %arg7[%c0_24, %c0_25] : memref<1x128xf32, #tpu.memory_space<vmem>>, vector<1x128xf32>
    %32 = vector.broadcast %31 : vector<1x128xf32> to vector<16x128xf32>
    %33 = arith.addf %30, %32 : vector<16x128xf32>
    %34 = vector.extract_strided_slice %33 {offsets = [0, 0], sizes = [16, 2], strides = [1, 1]} : vector<16x128xf32> to vector<16x2xf32>
    %c0_26 = arith.constant 0 : index
    %c0_27 = arith.constant 0 : index
    %35 = vector.load %arg8[%c0_26, %c0_27] : memref<16x2xf32, #tpu.memory_space<vmem>>, vector<16x2xf32>
    tpu.vector_store %arg8[%c0_26, %c0_27], %34 {strides = array<i32>} : memref<16x2xf32, #tpu.memory_space<vmem>>, vector<16x2xf32>,
    return
  }
  func.func @transform_0(%arg0: i32) -> (i32, i32) {
    %c0_i32 = arith.constant 0 : i32
    %c0_i32_0 = arith.constant 0 : i32
    return %arg0, %c0_i32 : i32, i32
  }
  func.func @transform_1(%arg0: i32) -> (i32, i32) {
    %c0_i32 = arith.constant 0 : i32
    %c0_i32_0 = arith.constant 0 : i32
    %c0_i32_1 = arith.constant 0 : i32
    return %c0_i32, %c0_i32_0 : i32, i32
  }
  func.func @transform_2(%arg0: i32) -> (i32, i32) {
    %c0_i32 = arith.constant 0 : i32
    %c0_i32_0 = arith.constant 0 : i32
    %c0_i32_1 = arith.constant 0 : i32
    return %c0_i32, %c0_i32_0 : i32, i32
  }
  func.func @transform_3(%arg0: i32) -> (i32, i32, i32) {
    %c0_i32 = arith.constant 0 : i32
    %c0_i32_0 = arith.constant 0 : i32
    %c0_i32_1 = arith.constant 0 : i32
    %c0_i32_2 = arith.constant 0 : i32
    return %c0_i32, %c0_i32_0, %c0_i32_1 : i32, i32, i32
  }
  func.func @transform_4(%arg0: i32) -> (i32, i32, i32) {
    %c0_i32 = arith.constant 0 : i32
    %c0_i32_0 = arith.constant 0 : i32
    %c0_i32_1 = arith.constant 0 : i32
    %c0_i32_2 = arith.constant 0 : i32
    return %c0_i32, %c0_i32_0, %c0_i32_1 : i32, i32, i32
  }
  func.func @transform_5(%arg0: i32) -> (i32, i32) {
    %c0_i32 = arith.constant 0 : i32
    %c0_i32_0 = arith.constant 0 : i32
    %c0_i32_1 = arith.constant 0 : i32
    return %c0_i32, %c0_i32_0 : i32, i32
  }
  func.func @transform_6(%arg0: i32) -> (i32, i32) {
    %c0_i32 = arith.constant 0 : i32
    %c0_i32_0 = arith.constant 0 : i32
    %c0_i32_1 = arith.constant 0 : i32
    return %c0_i32, %c0_i32_0 : i32, i32
  }
  func.func @transform_7(%arg0: i32) -> (i32, i32) {
    %c0_i32 = arith.constant 0 : i32
    %c0_i32_0 = arith.constant 0 : i32
    return %arg0, %c0_i32 : i32, i32
  }
}

</mosaic_0001>

<bundles_post_ra>
// kernel: tpu_custom_call.1
= control target key start
LH: loop header
LB: loop body
LE: loop exit
PB: predicated region body
PF: predicated region fallthrough
CT: control target
= control target key end

     0   :  { %12 = vsyncpa [#allocation3], 0  ;;  %s1255_s0 = inlined_call_operand.hbm [shape: bf16[16,392], index: 0, kind: input, shape index: {}]   ;;  %s1256_s1 = inlined_call_operand.hbm [shape: bf16[392,128], index: 1, kind: input, shape index: {}]   ;;  %s1257_s2 = inlined_call_operand.vmem [shape: f32[1,128], index: 2, kind: input, shape index: {}]   ;;  %s1258_s3 = inlined_call_operand.hbm [shape: bf16[2,128,128], index: 3, kind: input, shape index: {}]   ;;  %s1259_s4 = inlined_call_operand.vmem [shape: f32[2,1,128], index: 4, kind: input, shape index: {}]   ;;  %s1260_s5 = inlined_call_operand.hbm [shape: bf16[128,128], index: 5, kind: input, shape index: {}]   ;;  %s1261_s6 = inlined_call_operand.vmem [shape: f32[1,128], index: 6, kind: input, shape index: {}]   ;;  %s1262_s7 = inlined_call_operand.vmem [shape: f32[16,2], index: 7, kind: output, shape index: {}]  }
   0x1   :  { %13 = vsyncpa [#allocation5], 0 }
   0x2   :  { %14 = vsyncpa [#allocation8], 0  ;;  %s1083_s24 = smov [#allocation4]   ;;  %s989_s28 = scalar_lea.hbm %s1256_s1, 3136 }
   0x3   :  { %s32_s25 = sshll.u32 %s1083_s24, 4  ;;  %p990_p0 = scmp.ne.s32.totalorder %s1256_s1, %s989_s28  ;;  %s33_s25 = int_to_ptr.vmem [resolvable:$true] %s32_s25 }
   0x4   :  { %p993_p1 = scmp.lt.u32.totalorder %s989_s28, %s1256_s1 }
   0x6   :  { %p995_p2 = pnand %p993_p1, %p990_p0 }
   0x8   :  { %998 = shalt.err (!%p995_p2)
}
   0x9   :  { %s999_s10 = scalar_lea.vmem %s33_s25, 3136  ;;  %p1004_p4 = scmp.lt.s32.totalorder %s33_s25, %s33_s25 }
   0xa   :  { %p1000_p3 = scmp.ne.s32.totalorder %s33_s25, %s999_s10  ;;  %p1005_p5 = scmp.lt.s32.totalorder %s999_s10, %s999_s10 }
   0xc   :  { %p1006_p6 = por %p1005_p5, %p1004_p4 }
   0xe   :  { %p1007_p7 = pnand %p1006_p6, %p1000_p3 }
  0x10   :  { %1010 = shalt.err (!%p1007_p7)
}
  0x11   :  { %s1084_s11 = smov 64   ;;  %s1085_s12 = smov 4  }
  0x12   :  { %38 = dma.hbm_to_vmem [thread:$0]  %s1256_s1, 3136, %s33_s25, [#allocation5], %s1084_s11, %s1084_s11, %s1085_s12  }
  0x13   :  { %s1086_s15 = smov [#allocation2]   ;;  %s1011_s19 = scalar_lea.hbm %s1255_s0, 512 }
  0x14   :  { %s20_s16 = sshll.u32 %s1086_s15, 4  ;;  %p1012_p8 = scmp.ne.s32.totalorder %s1255_s0, %s1011_s19  ;;  %s21_s16 = int_to_ptr.vmem [resolvable:$true] %s20_s16 }
  0x15   :  { %p1015_p9 = scmp.lt.u32.totalorder %s1011_s19, %s1255_s0 }
  0x17   :  { %p1017_p10 = pnand %p1015_p9, %p1012_p8 }
  0x19   :  { %1020 = shalt.err (!%p1017_p10)
}
  0x1a   :  { %s1021_s24 = scalar_lea.vmem %s21_s16, 512  ;;  %p1026_p12 = scmp.lt.s32.totalorder %s21_s16, %s21_s16 }
  0x1b   :  { %p1022_p11 = scmp.ne.s32.totalorder %s21_s16, %s1021_s24  ;;  %p1027_p13 = scmp.lt.s32.totalorder %s1021_s24, %s1021_s24 }
  0x1d   :  { %p1028_p0 = por %p1027_p13, %p1026_p12 }
  0x1f   :  { %p1029_p1 = pnand %p1028_p0, %p1022_p11 }
  0x21   :  { %1032 = shalt.err (!%p1029_p1)
}
  0x22   :  { %s1087_s1 = smov 256   ;;  %s1088_s25 = smov 16  }
  0x23   :  { %26 = dma.hbm_to_vmem [thread:$0]  %s1255_s0, 512, %s21_s16, [#allocation3], %s1087_s1, %s1087_s1, %s1088_s25  }
  0x24   :  { %s1089_s28 = smov [#allocation6]   ;;  %s1090_s30 = smov [#allocation7]  }
  0x25   :  { %s46_s29 = sshll.u32 %s1089_s28, 4  ;;  %s60_s8 = sshll.u32 %s1090_s30, 4  ;;  %s47_s29 = int_to_ptr.vmem [resolvable:$true] %s46_s29  ;;  %s1161_s8 = int_to_ptr.vmem [resolvable:$true] %s60_s8 }
  0x26   :  { %s1033_s13 = scalar_lea.hbm %s1258_s3, 2048 }
  0x27   :  { %p1034_p2 = scmp.ne.s32.totalorder %s1258_s3, %s1033_s13  ;;  %p1037_p3 = scmp.lt.u32.totalorder %s1033_s13, %s1258_s3 }
  0x29   :  { %p1039_p4 = pnand %p1037_p3, %p1034_p2 }
  0x2b   :  { %1042 = shalt.err (!%p1039_p4)
}
  0x2c   :  { %s1043_s0 = scalar_lea.vmem %s47_s29, 2048  ;;  %p1048_p6 = scmp.lt.s32.totalorder %s47_s29, %s47_s29 }
  0x2d   :  { %p1044_p5 = scmp.ne.s32.totalorder %s47_s29, %s1043_s0  ;;  %p1049_p7 = scmp.lt.s32.totalorder %s1043_s0, %s1043_s0 }
  0x2f   :  { %p1050_p8 = por %p1049_p7, %p1048_p6 }
  0x31   :  { %p1051_p9 = pnand %p1050_p8, %p1044_p5 }
  0x33   :  { %1054 = shalt.err (!%p1051_p9)
}
  0x34   :  { %52 = dma.hbm_to_vmem [thread:$0]  %s1258_s3, 2048, %s47_s29, [#allocation5], %s1084_s11, %s1084_s11, %s1085_s12  }
  0x35   :  { %s1055_s22 = scalar_lea.hbm %s1260_s5, 1024 }
  0x36   :  { %p1056_p10 = scmp.ne.s32.totalorder %s1260_s5, %s1055_s22  ;;  %p1059_p11 = scmp.lt.u32.totalorder %s1055_s22, %s1260_s5 }
  0x38   :  { %p1061_p12 = pnand %p1059_p11, %p1056_p10 }
  0x3a   :  { %1064 = shalt.err (!%p1061_p12)
}
  0x3b   :  { %s1065_s26 = scalar_lea.vmem %s1161_s8, 1024  ;;  %p1070_p0 = scmp.lt.s32.totalorder %s1161_s8, %s1161_s8 }
  0x3c   :  { %p1066_p13 = scmp.ne.s32.totalorder %s1161_s8, %s1065_s26  ;;  %p1071_p1 = scmp.lt.s32.totalorder %s1065_s26, %s1065_s26 }
  0x3e   :  { %p1072_p2 = por %p1071_p1, %p1070_p0 }
  0x40   :  { %p1073_p3 = pnand %p1072_p2, %p1066_p13 }
  0x42   :  { %1076 = shalt.err (!%p1073_p3)
}
  0x43   :  { %66 = dma.hbm_to_vmem [thread:$0]  %s1260_s5, 1024, %s1161_s8, [#allocation8], %s1084_s11, %s1084_s11, %s1085_s12  }
  0x44   :  { %1077 = dma.done.wait [#allocation3], 512  }
  0x45   :  { %1078 = vsyncadd [#allocation3], 4294966784 }
  0x46   :  { %1079 = dma.done.wait [#allocation5], 5184  }
  0x47   :  { %1080 = vsyncadd [#allocation5], 4294962112 }
  0x48   :  { %1081 = dma.done.wait [#allocation8], 1024  }
  0x49   :  { %1082 = vsyncadd [#allocation8], 4294966272  ;;  %v1091_v0 = vmov 0   ;;  %v934_v1 = vld [vmem:[#allocation4 + $0x40] sm:$0xff]   ;;  %v937_v4 = vld [vmem:[#allocation4 + $0x48] sm:$0xff]   ;;  %vm308_vm0 = vcmask 64512  }
  0x4a   :  { %357 = vmatprep.subr.bf16.mxu1 %v1091_v0  ;;  %v935_v2 = vld [vmem:[#allocation4 + $0x80] sm:$0xff]   ;;  %814 = vmatprep.subr.bf16.mxu0 %v934_v1  ;;  %v938_v5 = vld [vmem:[#allocation4 + $0x88] sm:$0xff]   ;;  %v940_v7 = vld [vmem:[#allocation4 + $0x50] sm:$0xff]   ;;  %vm312_vm1 = vcmask 1043456   ;;  %v1092_v32 = vmov 0.0   ;;  %vm1093_vm2 = vmmov 0  }
  0x4b   :  { %v936_v3 = vld [vmem:[#allocation4] sm:$0xff]   ;;  %358 = vmatpush1.bf16.msra.mxu1 %v935_v2  ;;  %v939_v6 = vld [vmem:[#allocation4 + $0x8] sm:$0xff]   ;;  %v941_v8 = vld [vmem:[#allocation4 + $0x90] sm:$0xff]   ;;  %vm745_vm3 = vcmask 15360  }
  0x4c   :  { %815 = vmatpush3.bf16.msra.mxu0 %v936_v3  ;;  %359 = vmatprep.subr.bf16.mxu1 %v1091_v0  ;;  %v942_v9 = vld [vmem:[#allocation4 + $0x10] sm:$0xff]   ;;  %v943_v10 = vld [vmem:[#allocation4 + $0x58] sm:$0xff]   ;;  %v946_v13 = vld [vmem:[#allocation4 + $0x60] sm:$0xff]  }
  0x4d   :  { %816 = vmatprep.subr.bf16.mxu0 %v937_v4  ;;  %v944_v11 = vld [vmem:[#allocation4 + $0x98] sm:$0xff]   ;;  %v947_v14 = vld [vmem:[#allocation4 + $0xa0] sm:$0xff]   ;;  %v949_v16 = vld [vmem:[#allocation4 + $0x68] sm:$0xff]  }
  0x4e   :  { %v945_v12 = vld [vmem:[#allocation4 + $0x18] sm:$0xff]   ;;  %v948_v15 = vld [vmem:[#allocation4 + $0x20] sm:$0xff]   ;;  %v950_v17 = vld [vmem:[#allocation4 + $0xa8] sm:$0xff]  }
  0x4f   :  { %360 = vmatpush1.bf16.msra.mxu1 %v938_v5  ;;  %v951_v18 = vld [vmem:[#allocation4 + $0x28] sm:$0xff]   ;;  %v952_v19 = vld [vmem:[#allocation4 + $0x70] sm:$0xff]   ;;  %v955_v22 = vld [vmem:[#allocation4 + $0x78] sm:$0xff]  }
  0x50   :  { %817 = vmatpush3.bf16.msra.mxu0 %v939_v6  ;;  %361 = vmatprep.subr.bf16.mxu1 %v1091_v0  ;;  %v953_v20 = vld [vmem:[#allocation4 + $0xb0] sm:$0xff]   ;;  %v956_v23 = vld [vmem:[#allocation4 + $0xb8] sm:$0xff]   ;;  %v961_v26 = vld [vmem:[#allocation4 + $0xc0] ss:$0 sps:$4 sm:$0xff]  }
  0x51   :  { %818 = vmatprep.subr.bf16.mxu0 %v940_v7  ;;  %v954_v21 = vld [vmem:[#allocation4 + $0x30] sm:$0xff]   ;;  %v957_v25 = vld [vmem:[#allocation4 + $0x38] sm:$0xff]   ;;  %v314_v29 = vsel %vm312_vm1, %v961_v26, 0  ;;  %v965_v31 = vld [vmem:[#allocation6] sm:$0xff]  }
  0x52   :  { %v960_v24 = vld [vmem:[#allocation2 + $0x4] ss:$16 sps:$4 sm:$0xff]   ;;  %v964_v27 = vld [vmem:[#allocation2 + $0xc] ss:$16 sps:$4 sm:$0xff]   ;;  %v958_v28 = vld [vmem:[#allocation2] ss:$16 sps:$4 sm:$0xff]  }
  0x53   :  { %362 = vmatpush1.bf16.msra.mxu1 %v941_v8  ;;  %348 = vmatprep.mubr.bf16.mxu0 %v960_v24  ;;  %v962_v30 = vld [vmem:[#allocation2 + $0x8] ss:$16 sps:$4 sm:$0xff]   ;;  %v966_v33 = vld [vmem:[#allocation6 + $0x8] sm:$0xff]   ;;  %v968_v35 = vld [vmem:[#allocation6 + $0x18] sm:$0xff]  }
  0x54   :  { %819 = vmatpush3.bf16.msra.mxu0 %v942_v9  ;;  %363 = vmatprep.subr.bf16.mxu1 %v1091_v0  ;;  %v967_v34 = vld [vmem:[#allocation6 + $0x10] sm:$0xff]   ;;  %v969_v36 = vld [vmem:[#allocation6 + $0x20] sm:$0xff]   ;;  %v970_v37 = vld [vmem:[#allocation6 + $0x28] sm:$0xff]  }
  0x55   :  { %820 = vmatprep.subr.bf16.mxu0 %v943_v10  ;;  %785 = vmatprep.mubr.msk.bf16.mxu1 %vm308_vm0, %v964_v27  ;;  %v971_v38 = vld [vmem:[#allocation6 + $0x30] sm:$0xff]   ;;  %v972_v39 = vld [vmem:[#allocation6 + $0x38] sm:$0xff]   ;;  %v973_v40 = vld [vmem:[#allocation6 + $0x40] sm:$0xff]  }
  0x56   :  { %v974_v41 = vld [vmem:[#allocation6 + $0x48] sm:$0xff]   ;;  %v975_v42 = vld [vmem:[#allocation6 + $0x50] sm:$0xff]   ;;  %v976_v43 = vld [vmem:[#allocation6 + $0x58] sm:$0xff]  }
  0x57   :  { %364 = vmatpush1.bf16.msra.mxu1 %v944_v11  ;;  %v977_v44 = vld [vmem:[#allocation6 + $0x60] sm:$0xff]   ;;  %v978_v45 = vld [vmem:[#allocation6 + $0x68] sm:$0xff]   ;;  %v755_v48 = vld [vmem:[%s1257_s2] ss:$0 sm:$0xff] }
  0x58   :  { %821 = vmatpush3.bf16.msra.mxu0 %v945_v12  ;;  %365 = vmatprep.subr.bf16.mxu1 %v1091_v0  ;;  %v980_v1 = vld [vmem:[#allocation6 + $0x78] sm:$0xff]   ;;  %v981_v2 = vld [vmem:[#allocation7] sm:$0xff]   ;;  %v982_v3 = vld [vmem:[#allocation7 + $0x8] sm:$0xff]  }
  0x59   :  { %822 = vmatprep.subr.bf16.mxu0 %v946_v13  ;;  %v983_v4 = vld [vmem:[#allocation7 + $0x10] sm:$0xff]   ;;  %v984_v5 = vld [vmem:[#allocation7 + $0x18] sm:$0xff]   ;;  %v985_v6 = vld [vmem:[#allocation7 + $0x20] sm:$0xff]  }
  0x5a   :  { %v986_v7 = vld [vmem:[#allocation7 + $0x28] sm:$0xff]   ;;  %v786_v8 = vld [vmem:[%s1259_s4] ss:$0 sm:$0xff] }
  0x5b   :  { %366 = vmatpush1.bf16.msra.mxu1 %v947_v14 }
  0x5c   :  { %823 = vmatpush3.bf16.msra.mxu0 %v948_v15  ;;  %367 = vmatprep.subr.bf16.mxu1 %v1091_v0 }
  0x5d   :  { %824 = vmatprep.subr.bf16.mxu0 %v949_v16 }
  0x5f   :  { %368 = vmatpush1.bf16.msra.mxu1 %v950_v17 }
  0x60   :  { %825 = vmatpush3.bf16.msra.mxu0 %v951_v18  ;;  %369 = vmatprep.subr.bf16.mxu1 %v1091_v0  ;;  %v987_v18 = vld [vmem:[#allocation7 + $0x30] sm:$0xff]  }
  0x61   :  { %826 = vmatprep.subr.bf16.mxu0 %v952_v19  ;;  %v988_v19 = vld [vmem:[#allocation7 + $0x38] sm:$0xff]  }
  0x63   :  { %370 = vmatpush1.bf16.msra.mxu1 %v953_v20  ;;  %v796_v20 = vld [vmem:[%s1259_s4 + $0x1] ss:$0 sm:$0xff] }
  0x64   :  { %827 = vmatpush3.bf16.msra.mxu0 %v954_v21  ;;  %371 = vmatprep.subr.bf16.mxu1 %v1091_v0 }
  0x65   :  { %828 = vmatprep.subr.bf16.mxu0 %v955_v22 }
  0x67   :  { %372 = vmatpush1.bf16.msra.mxu1 %v956_v23 }
  0x68   :  { %829 = vmatpush3.bf16.msra.mxu0 %v957_v25  ;;  %373 = vmatprep.subr.bf16.mxu1 %v1091_v0  ;;  %v979_v0 = vld [vmem:[#allocation6 + $0x70] sm:$0xff]  }
  0x69   :  { %863 = vmatprep.subr.bf16.mxu0 %v1092_v32 }
  0x6b   :  { %349 = vmatmul.mubr.bf16.vlgmr.msra.gmra.mrb[0].mxu0 %v958_v28  ;;  %374 = vmatpush1.bf16.msra.mxu1 %v314_v29 }
  0x6c   :  { %864 = vmatpush3.bf16.msra.mxu0 %v965_v31  ;;  %883 = vmatprep.subr.bf16.mxu1 %v1092_v32 }
  0x6d   :  { %865 = vmatprep.subr.bf16.mxu0 %v1092_v32  ;;  %879 = vmatprep.mubr.msk.bf16.mxu0 %vm1093_vm2, %v1092_v32 }
  0x6e   :  { %390 = vmatmul.mubr.bf16.vlgmr.msra.gmra.mrb[0].mxu1 %v962_v30  ;;  %v805_v30 = vld [vmem:[%s1261_s6] ss:$0 sm:$0xff] }
  0x6f   :  { %899 = vmatprep.mubr.msk.bf16.mxu1 %vm1093_vm2, %v1092_v32  ;;  %884 = vmatpush3.bf16.msra.mxu1 %v973_v40 }
  0x70   :  { %866 = vmatpush3.bf16.msra.mxu0 %v966_v33  ;;  %885 = vmatprep.subr.bf16.mxu1 %v1092_v32 }
  0x71   :  { %867 = vmatprep.subr.bf16.mxu0 %v1092_v32 }
  0x73   :  { %886 = vmatpush3.bf16.msra.mxu1 %v974_v41 }
  0x74   :  { %868 = vmatpush3.bf16.msra.mxu0 %v967_v34  ;;  %887 = vmatprep.subr.bf16.mxu1 %v1092_v32 }
  0x75   :  { %869 = vmatprep.subr.bf16.mxu0 %v1092_v32 }
  0x77   :  { %888 = vmatpush3.bf16.msra.mxu1 %v975_v42 }
  0x78   :  { %870 = vmatpush3.bf16.msra.mxu0 %v968_v35  ;;  %889 = vmatprep.subr.bf16.mxu1 %v1092_v32 }
  0x79   :  { %871 = vmatprep.subr.bf16.mxu0 %v1092_v32 }
  0x7b   :  { %890 = vmatpush3.bf16.msra.mxu1 %v976_v43 }
  0x7c   :  { %872 = vmatpush3.bf16.msra.mxu0 %v969_v36  ;;  %891 = vmatprep.subr.bf16.mxu1 %v1092_v32 }
  0x7d   :  { %873 = vmatprep.subr.bf16.mxu0 %v1092_v32 }
  0x7f   :  { %892 = vmatpush3.bf16.msra.mxu1 %v977_v44 }
  0x80   :  { %874 = vmatpush3.bf16.msra.mxu0 %v970_v37  ;;  %893 = vmatprep.subr.bf16.mxu1 %v1092_v32 }
  0x81   :  { %875 = vmatprep.subr.bf16.mxu0 %v1092_v32 }
  0x83   :  { %894 = vmatpush3.bf16.msra.mxu1 %v978_v45 }
  0x84   :  { %876 = vmatpush3.bf16.msra.mxu0 %v971_v38  ;;  %895 = vmatprep.subr.bf16.mxu1 %v1092_v32 }
  0x85   :  { %877 = vmatprep.subr.bf16.mxu0 %v1092_v32 }
  0x87   :  { %896 = vmatpush3.bf16.msra.mxu1 %v979_v0 }
  0x88   :  { %878 = vmatpush3.bf16.msra.mxu0 %v972_v39  ;;  %897 = vmatprep.subr.bf16.mxu1 %v1092_v32 }
  0x89   :  { %903 = vmatprep.subr.bf16.mxu0 %v1092_v32 }
  0x8b   :  { %898 = vmatpush3.bf16.msra.mxu1 %v980_v1 }
 0x13e   :  { %v830_v46 = vpop.f32.mrb[0].mxu0 }
 0x13f   :  { %v831_v47 = vpop.f32.mrb[1].mxu0 }
 0x140   :  { %v832_v49 = vadd.f32 %v831_v47, %v830_v46  ;;  %v833_v50 = vpop.f32.mrb[2].mxu0 }
 0x141   :  { %v834_v51 = vpop.f32.mrb[3].mxu0  ;;  %v391_v52 = vpop.f32.mrb[0].mxu1 }
 0x142   :  { %v835_v53 = vadd.f32 %v834_v51, %v833_v50  ;;  %v351_v54 = vadd.f32 %v832_v49, %v755_v48  ;;  %v393_v55 = vpop.f32.mrb[1].mxu1 }
 0x143   :  { %v394_v56 = vpop.f32.mrb[2].mxu1 }
 0x144   :  { %v392_v57 = vadd.f32 %v391_v52, %v351_v54  ;;  %v354_v58 = vadd.f32 %v835_v53, %v755_v48  ;;  %v396_v59 = vpop.f32.mrb[3].mxu1 }
 0x146   :  { %v395_v60 = vadd.f32 %v394_v56, %v354_v58  ;;  %v398_v61 = vmax.f32 %v392_v57, 0.0 }
 0x148   :  { %v399_v62 = vmax.f32 %v395_v60, 0.0 }
 0x14a   :  { %v400_v63 = vpack.c.bf16 %v399_v62, %v398_v61 }
 0x14c   :  { %880 = vmatmul.mubr.bf16.vlgmr.msra.gmra.mrb[4].mxu0 %v400_v63 }
 0x14d   :  { %919 = vmatprep.mubr.msk.bf16.mxu0 %vm1093_vm2, %v1092_v32  ;;  %904 = vmatpush3.bf16.msra.mxu0 %v981_v2 }
 0x14e   :  { %905 = vmatprep.subr.bf16.mxu0 %v1092_v32 }
 0x151   :  { %906 = vmatpush3.bf16.msra.mxu0 %v982_v3 }
 0x152   :  { %907 = vmatprep.subr.bf16.mxu0 %v1092_v32 }
 0x155   :  { %908 = vmatpush3.bf16.msra.mxu0 %v983_v4 }
 0x156   :  { %909 = vmatprep.subr.bf16.mxu0 %v1092_v32 }
 0x159   :  { %910 = vmatpush3.bf16.msra.mxu0 %v984_v5 }
 0x15a   :  { %911 = vmatprep.subr.bf16.mxu0 %v1092_v32 }
 0x15d   :  { %912 = vmatpush3.bf16.msra.mxu0 %v985_v6 }
 0x15e   :  { %913 = vmatprep.subr.bf16.mxu0 %v1092_v32 }
 0x161   :  { %914 = vmatpush3.bf16.msra.mxu0 %v986_v7 }
 0x162   :  { %915 = vmatprep.subr.bf16.mxu0 %v1092_v32 }
 0x165   :  { %916 = vmatpush3.bf16.msra.mxu0 %v987_v18 }
 0x166   :  { %917 = vmatprep.subr.bf16.mxu0 %v1092_v32 }
 0x169   :  { %918 = vmatpush3.bf16.msra.mxu0 %v988_v19 }
 0x21f   :  { %v506_v9 = vpop.f32.mrb[4].mxu0 }
 0x220   :  { %v507_v10 = vadd.f32 %v786_v8, %v506_v9  ;;  %v881_v11 = vpop.f32.mrb[5].mxu0 }
 0x221   :  { %v509_v12 = vpop.f32.mrb[6].mxu0 }
 0x222   :  { %v510_v13 = vadd.f32 %v786_v8, %v509_v12  ;;  %v882_v14 = vpop.f32.mrb[7].mxu0  ;;  %v513_v15 = vmax.f32 %v507_v10, 0.0 }
 0x224   :  { %v514_v16 = vmax.f32 %v510_v13, 0.0 }
 0x226   :  { %v515_v17 = vpack.c.bf16 %v514_v16, %v513_v15 }
 0x228   :  { %900 = vmatmul.mubr.bf16.vlgmr.msra.gmra.mrb[4].mxu1 %v515_v17 }
 0x2fb   :  { %v623_v21 = vpop.f32.mrb[4].mxu1 }
 0x2fc   :  { %v624_v22 = vadd.f32 %v796_v20, %v623_v21  ;;  %v901_v23 = vpop.f32.mrb[5].mxu1 }
 0x2fd   :  { %v626_v24 = vpop.f32.mrb[6].mxu1 }
 0x2fe   :  { %v627_v25 = vadd.f32 %v796_v20, %v626_v24  ;;  %v902_v26 = vpop.f32.mrb[7].mxu1  ;;  %v630_v27 = vmax.f32 %v624_v22, 0.0 }
 0x300   :  { %v631_v28 = vmax.f32 %v627_v25, 0.0 }
 0x302   :  { %v632_v29 = vpack.c.bf16 %v631_v28, %v630_v27 }
 0x304   :  { %920 = vmatmul.mubr.bf16.vlgmr.msra.gmra.mrb[8].mxu0 %v632_v29 }
 0x3d7   :  { %v738_v31 = vpop.f32.mrb[8].mxu0 }
 0x3d8   :  { %v739_v32 = vadd.f32 %v805_v30, %v738_v31  ;;  %v921_v33 = vpop.f32.mrb[9].mxu0 }
 0x3d9   :  { %v741_v34 = vpop.f32.mrb[10].mxu0 }
 0x3da   :  { %746 = vst.msk [vmem:[%s1262_s7] sm:$0xff] %vm745_vm3, %v739_v32  ;;  %v742_v35 = vadd.f32 %v805_v30, %v741_v34  ;;  %v922_v36 = vpop.f32.mrb[11].mxu0 }
 0x3dc   :  { %747 = vst.msk [vmem:[%s1262_s7 + $0x8] sm:$0xff] %vm745_vm3, %v742_v35 }
 0x3dd   :  { %752 = vsyncpa [#allocation3], 1 }
 0x3de   :  { %753 = vsyncpa [#allocation5], 1 }
 0x3df   :  { %754 = vsyncpa [#allocation8], 1 }

</bundles_post_ra>
